<compile_context>
chip_gen: v6e
topology: v6e:2x2x1
jax: 0.10.0
libtpu: 0.0.40
codegen_flags: <defaults>
</compile_context>

<pallas_src>
import functools

import jax
import jax.numpy as jnp
from jax import lax
from jax.experimental import pallas as pl
from jax.experimental.pallas import tpu as pltpu

EPS = 1e-6

_TARGET_BLOCK_BYTES = 4 * 1024 * 1024      # ~4 MiB streaming blocks
_MAX_SINGLE_ROW_BYTES = 512 * 1024         # above this, tile HW with an accumulator
_PACK_TARGET_WIDTH = 2048                  # aim packed lane-row width ~2048 elems
_VMEM_LIMIT_BYTES = 32 * 1024 * 1024       # safe on v5e/v6e/v7x (64 MiB physical)


# --------------------------------------------------------------------------
# small helpers
# --------------------------------------------------------------------------
def _cdiv(a, b):
    return -(-a // b)


def _round_up(a, b):
    return _cdiv(a, b) * b


def _static_p(p):
    """p as a Python float if statically known, else None (tracer).

    NOTE: pulls the scalar to host once per call when p is a concrete device
    array (benign; pass a Python float, or jit with p as an argument to use the
    runtime-p kernel instead).
    """
    if isinstance(p, (int, float)):
        return float(p)
    try:
        return float(jnp.asarray(p).reshape(()))   # raises on tracers
    except Exception:
        return None


def _is_small_int(p_static):
    return (p_static is not None
            and float(p_static) == int(p_static)
            and 1 <= int(p_static) <= 16)


def _pow_int(x, n):
    """x**n by square-and-multiply (n >= 1): p=3 -> 2 muls, p=8 -> 3 muls."""
    acc, base = None, x
    while n:
        if n & 1:
            acc = base if acc is None else acc * base
        n >>= 1
        if n:
            base = base * base
    return acc


def _apply_pow(x, p_static, p_ref):
    """x**p for x >= EPS > 0 (per-element hot path)."""
    if p_static is None:
        p = p_ref[0]
        return jnp.exp(p * jnp.log(x))            # runtime p: EUP fallback
    if _is_small_int(p_static):
        return _pow_int(x, int(p_static))          # VPU-only
    return jnp.exp(float(p_static) * jnp.log(x))


def _apply_root(m, p_static, p_ref):
    """m**(1/p) for m > 0 (only ~one value per (B,C) row; cheap)."""
    if p_static is None:
        return jnp.exp(jnp.log(m) / p_ref[0])
    p = float(p_static)
    if p == 1.0:
        return m
    if p == 2.0:
        return jnp.sqrt(m)
    if p == 4.0:
        return jnp.sqrt(jnp.sqrt(m))
    if p == 8.0:
        return jnp.sqrt(jnp.sqrt(jnp.sqrt(m)))
    return jnp.exp(jnp.log(m) * (1.0 / p))


def _choose_rows_tile(num_rows, row_bytes, target_bytes=_TARGET_BLOCK_BYTES):
    rt = max(1, target_bytes // max(1, row_bytes))
    # Expose >= ~4 row tiles so v7x's two TensorCores both get grid steps and
    # the pipeline has something to overlap (harmless on v5e/v6e).
    rt = min(rt, _round_up(_cdiv(num_rows, 4), 8))
    rt = max(8, (rt // 8) * 8)                     # sublane multiple
    if rt >= num_rows:
        return num_rows                            # full extent is always legal
    return rt


def _choose_pack(bc, hw):
    """g rows packed per lane row: g | bc, g*hw <= ~2048, keep >= ~16 rows."""
    if hw >= _PACK_TARGET_WIDTH:
        return 1
    g_max = min(bc, 256, _PACK_TARGET_WIDTH // hw, max(1, bc // 16))
    for g in range(g_max, 1, -1):
        if bc % g == 0:
            return g
    return 1


def _cost_estimate(bc, hw, itemsize, p_static):
    elems = bc * hw
    if _is_small_int(p_static):
        flops, transc = 4 * elems, 2 * bc
    else:
        flops, transc = 3 * elems, 2 * elems + 2 * bc
    return pl.CostEstimate(flops=flops, transcendentals=transc,
                           bytes_accessed=elems * itemsize + 4 * bc)


# --------------------------------------------------------------------------
# kernel bodies
# --------------------------------------------------------------------------
def _gem_rows_kernel(p_ref, x_ref, o_ref, *, p_static, hw):
    """One (B,C) row per lane row; per-row XLU reduce."""
    x = jnp.maximum(x_ref[...].astype(jnp.float32), EPS)
    xp = _apply_pow(x, p_static, p_ref)
    mean = jnp.sum(xp, axis=-1, keepdims=True) * (1.0 / hw)
    o_ref[...] = _apply_root(mean, p_static, p_ref).astype(o_ref.dtype)


def _gem_packed_kernel(p_ref, s_ref, x_ref, o_ref, *, p_static, hw, split_f32):
    """g rows packed per lane row; segment sums on the MXU via block-diag S.

    S is block diagonal, so each output column only sums its own HW-segment of
    its own row: no cross-row mixing (OOB tail rows stay self-contained).
    """
    x = jnp.maximum(x_ref[...].astype(jnp.float32), EPS)
    xp = _apply_pow(x, p_static, p_ref)
    s = s_ref[...]                                           # (g*hw, g) bf16 0/1
    if split_f32:
        # hi/lo bf16 split keeps the f32 segment sum ~f32-accurate while using
        # the well-trodden bf16 MXU path (MXU is idle here anyway).
        hi = xp.astype(jnp.bfloat16)
        lo = (xp - hi.astype(jnp.float32)).astype(jnp.bfloat16)
        sums = (jnp.dot(hi, s, preferred_element_type=jnp.float32)
                + jnp.dot(lo, s, preferred_element_type=jnp.float32))
    else:
        sums = jnp.dot(xp.astype(jnp.bfloat16), s,
                       preferred_element_type=jnp.float32)
    mean = sums * (1.0 / hw)
    o_ref[...] = _apply_root(mean, p_static, p_ref).astype(o_ref.dtype)


def _gem_acc_kernel(p_ref, x_ref, o_ref, *, p_static, hw, hw_tile, mask_tail):
    """2-D grid (rows x HW-chunks); the f32 output block is the accumulator."""
    k = pl.program_id(1)

    @pl.when(k == 0)
    def _():
        o_ref[...] = jnp.zeros_like(o_ref)

    x = jnp.maximum(x_ref[...].astype(jnp.float32), EPS)
    xp = _apply_pow(x, p_static, p_ref)
    if mask_tail:
        # Ragged HW: stale columns past HW in the last chunk belong to VALID
        # rows and must be zeroed before the row sum.
        col = lax.broadcasted_iota(jnp.int32, xp.shape, 1) + k * hw_tile
        xp = jnp.where(col < hw, xp, 0.0)
    o_ref[...] += jnp.sum(xp, axis=-1, keepdims=True)

    @pl.when(k == pl.num_programs(1) - 1)
    def _():
        mean = o_ref[...] * (1.0 / hw)
        o_ref[...] = _apply_root(mean, p_static, p_ref)


# --------------------------------------------------------------------------
# wrapper
# --------------------------------------------------------------------------
def gem_forward(x, p):
    """GeM pooling. x: (B, C, H, W); p: python scalar or ()/(1,) array.

    Returns (B, C, 1, 1) float32, matching the PyTorch module's forward.
    """
    B, C, H, W = x.shape
    BC, HW = B * C, H * W
    itemsize = jnp.dtype(x.dtype).itemsize

    p_static = _static_p(p)
    p_smem = jnp.asarray(p, jnp.float32).reshape(1)      # tiny; always passed
    ce = _cost_estimate(BC, HW, itemsize, p_static)
    p_spec = pl.BlockSpec(memory_space=pltpu.SMEM)
    params_1d = pltpu.CompilerParams(dimension_semantics=("parallel",),
                                     vmem_limit_bytes=_VMEM_LIMIT_BYTES)

    # ---- path 3: large spatial extent -> tile HW, accumulate in f32 output ----
    if HW * itemsize > _MAX_SINGLE_ROW_BYTES:
        x2d = x.reshape(BC, HW)
        hw_tile = max(512, (_TARGET_BLOCK_BYTES // (64 * itemsize)) // 128 * 128)
        hw_tile = min(hw_tile, _round_up(HW, 128))
        rows_tile = _choose_rows_tile(BC, hw_tile * itemsize)
        grid = (_cdiv(BC, rows_tile), _cdiv(HW, hw_tile))
        kernel = functools.partial(_gem_acc_kernel, p_static=p_static, hw=HW,
                                   hw_tile=hw_tile,
                                   mask_tail=(HW % hw_tile != 0))
        out = pl.pallas_call(
            kernel,
            out_shape=jax.ShapeDtypeStruct((BC, 1), jnp.float32),
            grid=grid,
            in_specs=[p_spec,
                      pl.BlockSpec((rows_tile, hw_tile), lambda i, k: (i, k))],
            out_specs=pl.BlockSpec((rows_tile, 1), lambda i, k: (i, 0)),
            compiler_params=pltpu.CompilerParams(
                dimension_semantics=("parallel", "arbitrary"),
                vmem_limit_bytes=_VMEM_LIMIT_BYTES),
            cost_estimate=ce,
        )(p_smem, x2d)
        return out.reshape(B, C, 1, 1)

    # ---- path 1: small HW -> lane packing + MXU segment sums ----
    g = _choose_pack(BC, HW)
    if g > 1:
        rows, width = BC // g, g * HW
        x2d = x.reshape(rows, width)                       # free reshape
        rows_tile = _choose_rows_tile(rows, width * itemsize)
        grid = (_cdiv(rows, rows_tile),)
        # Block-diagonal ones: S[k, j] = 1 iff j == k // HW  (segment sums).
        seg = jnp.repeat(jnp.eye(g, dtype=jnp.bfloat16), HW, axis=0)
        kernel = functools.partial(_gem_packed_kernel, p_static=p_static,
                                   hw=HW, split_f32=(itemsize >= 4))
        out = pl.pallas_call(
            kernel,
            out_shape=jax.ShapeDtypeStruct((rows, g), jnp.float32),
            grid=grid,
            in_specs=[p_spec,
                      pl.BlockSpec((width, g), lambda i: (0, 0)),   # fetched once
                      pl.BlockSpec((rows_tile, width), lambda i: (i, 0))],
            out_specs=pl.BlockSpec((rows_tile, g), lambda i: (i, 0)),
            compiler_params=params_1d,
            cost_estimate=ce,
        )(p_smem, seg, x2d)
        return out.reshape(B, C, 1, 1)

    # ---- path 2: medium HW -> one lane row per (B, C) pair ----
    x2d = x.reshape(BC, HW)
    rows_tile = _choose_rows_tile(BC, HW * itemsize)
    grid = (_cdiv(BC, rows_tile),)
    kernel = functools.partial(_gem_rows_kernel, p_static=p_static, hw=HW)
    out = pl.pallas_call(
        kernel,
        out_shape=jax.ShapeDtypeStruct((BC, 1), jnp.float32),
        grid=grid,
        in_specs=[p_spec, pl.BlockSpec((rows_tile, HW), lambda i: (i, 0))],
        out_specs=pl.BlockSpec((rows_tile, 1), lambda i: (i, 0)),
        compiler_params=params_1d,
        cost_estimate=ce,
    )(p_smem, x2d)
    return out.reshape(B, C, 1, 1)


def gem_reference(x, p):
    p = jnp.asarray(p, jnp.float32).reshape(())
    xp = jnp.maximum(x.astype(jnp.float32), EPS) ** p
    return jnp.mean(xp, axis=(-2, -1), keepdims=True) ** (1.0 / p)


# --------------------------------------------------------------------------
# demo / self-test
# --------------------------------------------------------------------------
if __name__ == "__main__":
    key = jax.random.PRNGKey(0)
    k1, k2, k3 = jax.random.split(key, 3)

    def check(x, p, name):
        out = jax.block_until_ready(gem_forward(x, p))
        ref = gem_reference(x, p)
        assert out.shape == ref.shape == x.shape[:2] + (1, 1), (name, out.shape)
        assert jnp.allclose(out, ref, rtol=2e-3, atol=1e-5), (name, out, ref)

    # 1) Primary small shape (per-row path), static integer p (nn.Parameter init = 3).
    x1 = jax.random.uniform(k1, (2, 4, 16, 16), jnp.float32, minval=-0.5, maxval=2.0)
    check(x1, 3, "rows / static p=3")

    # 2) Traced p (training-style): runtime SMEM-scalar kernel under jit.
    p_param = jnp.ones((1,), jnp.float32) * 3.0
    out_jit = jax.block_until_ready(jax.jit(gem_forward)(x1, p_param))
    assert out_jit.shape == (2, 4, 1, 1)
    assert jnp.allclose(out_jit, gem_reference(x1, p_param), rtol=2e-3, atol=1e-5)

    # 3) Typical CNN GeM shape (small HW) -> lane-packed + MXU segment-sum path.
    x2 = jax.random.uniform(k2, (2, 64, 7, 7), jnp.float32, minval=-0.5, maxval=2.0)
    check(x2, 3.0, "packed / static p=3")
    check(x2, 2.5, "packed / static non-integer p")

    # 4) Large spatial extent with ragged HW tiling -> 2-D accumulator path.
    x3 = jax.random.uniform(k3, (1, 1, 380, 380), jnp.float32, minval=-0.5, maxval=2.0)
    check(x3, 3, "large-HW accumulator")

    print("KERNEL_OK")
</pallas_src>

<mosaic_0001>
module attributes {stable_mosaic.version = 11 : i64} {
  func.func @_gem_rows_kernel(%arg0: i32, %arg1: memref<1xf32, #tpu.memory_space<smem>>, %arg2: memref<8x256xf32, #tpu.memory_space<vmem>>, %arg3: memref<8x1xf32, #tpu.memory_space<vmem>>) attributes {dimension_semantics = [#tpu.dimension_semantics<parallel>], iteration_bounds = array<i64: 1>, scalar_prefetch = 0 : i64, scratch_operands = 0 : i64, tpu.core_type = #tpu.core_type<tc>, window_params = [{transform_indices = @transform_0, window_bounds = array<i64: 1>}, {transform_indices = @transform_1, window_bounds = array<i64: 8, 256>}, {transform_indices = @transform_2, window_bounds = array<i64: 8, 1>}]} {
    %c0 = arith.constant 0 : index
    %c0_0 = arith.constant 0 : index
    %0 = vector.load %arg2[%c0, %c0_0] : memref<8x256xf32, #tpu.memory_space<vmem>>, vector<8x256xf32>
    %cst = arith.constant 9.99999997E-7 : f32
    %1 = vector.broadcast %cst : f32 to vector<8x256xf32>
    %2 = arith.maximumf %0, %1 : vector<8x256xf32>
    %3 = arith.mulf %2, %2 : vector<8x256xf32>
    %4 = arith.mulf %2, %3 : vector<8x256xf32>
    %cst_1 = arith.constant dense<0.000000e+00> : vector<8xf32>
    %5 = vector.multi_reduction <add>, %4, %cst_1 [1] : vector<8x256xf32> to vector<8xf32>
    %6 = vector.shape_cast %5 : vector<8xf32> to vector<8x1xf32>
    %cst_2 = arith.constant 3.906250e-03 : f32
    %7 = vector.broadcast %cst_2 : f32 to vector<8x1xf32>
    %8 = arith.mulf %6, %7 : vector<8x1xf32>
    %9 = math.log %8 : vector<8x1xf32>
    %cst_3 = arith.constant 0.333333343 : f32
    %10 = vector.broadcast %cst_3 : f32 to vector<8x1xf32>
    %11 = arith.mulf %9, %10 : vector<8x1xf32>
    %12 = math.exp %11 : vector<8x1xf32>
    %c0_4 = arith.constant 0 : index
    %c0_5 = arith.constant 0 : index
    %13 = vector.load %arg3[%c0_4, %c0_5] : memref<8x1xf32, #tpu.memory_space<vmem>>, vector<8x1xf32>
    tpu.vector_store %arg3[%c0_4, %c0_5], %12 {strides = array<i32>} : memref<8x1xf32, #tpu.memory_space<vmem>>, vector<8x1xf32>,
    return
  }
  func.func @transform_0(%arg0: i32) -> i32 {
    %c0_i32 = arith.constant 0 : i32
    %c0_i32_0 = arith.constant 0 : i32
    return %c0_i32 : i32
  }
  func.func @transform_1(%arg0: i32) -> (i32, i32) {
    %c0_i32 = arith.constant 0 : i32
    %c0_i32_0 = arith.constant 0 : i32
    return %arg0, %c0_i32 : i32, i32
  }
  func.func @transform_2(%arg0: i32) -> (i32, i32) {
    %c0_i32 = arith.constant 0 : i32
    %c0_i32_0 = arith.constant 0 : i32
    return %arg0, %c0_i32 : i32, i32
  }
}

</mosaic_0001>

<bundles_post_ra>
// kernel: tpu_custom_call.1
= control target key start
LH: loop header
LB: loop body
LE: loop exit
PB: predicated region body
PF: predicated region fallthrough
CT: control target
= control target key end

     0   :  { %8 = vsyncpa [#allocation4], 0  ;;  %s75_s9 = smov [#allocation3]   ;;  %s97_s0 = inlined_call_operand.<no memory space> [shape: f32[1], index: 0, kind: input, shape index: {}]   ;;  %s98_s1 = inlined_call_operand.hbm [shape: f32[8,256], index: 1, kind: input, shape index: {}]   ;;  %s99_s2 = inlined_call_operand.vmem [shape: f32[8,1], index: 2, kind: output, shape index: {}]  }
   0x1   :  { %s17_s10 = sshll.u32 %s75_s9, 4  ;;  %s18_s10 = int_to_ptr.vmem [resolvable:$true] %s17_s10 }
   0x2   :  { %s61_s11 = scalar_lea.vmem %s18_s10, 256  ;;  %p66_p1 = scmp.lt.s32.totalorder %s18_s10, %s18_s10 }
   0x3   :  { %p62_p0 = scmp.ne.s32.totalorder %s18_s10, %s61_s11  ;;  %p67_p2 = scmp.lt.s32.totalorder %s61_s11, %s61_s11 }
   0x5   :  { %p68_p3 = por %p67_p2, %p66_p1 }
   0x7   :  { %p69_p4 = pnand %p68_p3, %p62_p0 }
   0x9   :  { %72 = shalt.err (!%p69_p4)
}
   0xa   :  { %20 = dma.hbm_to_vmem [thread:$0]  %s98_s1, 256, %s18_s10, [#allocation4]  }
   0xb   :  { %73 = dma.done.wait [#allocation4], 256  }
   0xc   :  { %74 = vsyncadd [#allocation4], 4294967040  ;;  %v24_v0 = vld [vmem:[#allocation3] sm:$0xff]  ;;  %v25_v1 = vld [vmem:[#allocation3 + $0x8] sm:$0xff]  ;;  %vm41_vm0 = vcmask 7168  }
   0xd   :  { %v26_v2 = vmax.f32 %v24_v0, 1e-06  ;;  %v27_v3 = vmax.f32 %v25_v1, 1e-06 }
   0xf   :  { %v28_v4 = vmul.f32 %v26_v2, %v26_v2  ;;  %v29_v5 = vmul.f32 %v27_v3, %v27_v3 }
  0x11   :  { %v30_v6 = vmul.f32 %v28_v4, %v26_v2  ;;  %v31_v7 = vmul.f32 %v29_v5, %v27_v3 }
  0x13   :  { %v32_v8 = vadd.f32 %v31_v7, %v30_v6 }
  0x15   :  { %33 = vadd.xlane.f32.xlu0 %v32_v8 }
  0x9e   :  { %v34_v9 = vpop.xlane.xlu0 %33 }
  0x9f   :  { %v35_v10 = vmul.f32 0.00390625, %v34_v9 }
  0xa1   :  { %49 = vlog2.f32 %v35_v10 }
  0xae   :  { %v50_v11 = vpop.eup %49 }
  0xaf   :  { %v37_v12 = vmul.f32 0.6931472, %v50_v11 }
  0xb1   :  { %v38_v13 = vmul.f32 0.33333334, %v37_v12 }
  0xb3   :  { %v39_v14 = vmul.f32 1.442695, %v38_v13 }
  0xb5   :  { %51 = vpow2.f32 %v39_v14 }
  0xc2   :  { %v52_v15 = vpop.eup %51 }
  0xc3   :  { %42 = vst.msk [vmem:[%s99_s2] sm:$0xff] %vm41_vm0, %v52_v15 }
  0xc4   :  { %47 = vsyncpa [#allocation4], 1 }

</bundles_post_ra>
